<compile_context>
chip_gen: v6e
topology: v6e:2x2x1
jax: 0.10.0
libtpu: 0.0.40
codegen_flags: <defaults>
</compile_context>

<pallas_src>
import functools

import jax
import jax.numpy as jnp
from jax.experimental import pallas as pl
from jax.experimental.pallas import tpu as pltpu

IMG_DIMS = (16, 16)        # c.img_dims
CLAMP = 1.9                # soft-clamp for coupling scale (cINN-style)
INV_CLAMP = 1.0 / CLAMP    # multiply instead of divide (constant folded)


def _vmem_spec():
    return pl.BlockSpec(memory_space=pltpu.MemorySpace.VMEM)


# ----------------------------------------------------------------------------
# Fused forward kernel: everything VMEM-resident, one launch.
#   x      = x_ab + 0.05 * noise
#   xa, xb = split(x)
#   block1: inp = [xa | cond] @ W1 (K=512, bf16 MXU)  -> relu -> @ W2
#           s = CLAMP*tanh(st[:, :D]*INV_CLAMP); t = st[:, D:]
#           xb = xb*exp(s) + t ; lj1 = sum(s, axis=1)
#   block2: same with (xb, cond) transforming xa -> lj2
#   jac    = lj1 + lj2
#   zz     = sum(xa^2) + sum(xb^2)          (per sample)
#   out[:, 0] = zz, out[:, 1] = jac, lanes 2..127 = 0   (lane-dense slab)
# ----------------------------------------------------------------------------
def _fused_forward_kernel(x_ref, n_ref, c_ref,
                          w1a_ref, b1a_ref, w2a_ref, b2a_ref,
                          w1b_ref, b1b_ref, w2b_ref, b2b_ref,
                          out_ref):
    d = x_ref.shape[1] // 2

    # noise add fused into the kernel (no separate launch / HBM round trip)
    x = x_ref[...] + 0.05 * n_ref[...]
    xa = x[:, :d]
    xb = x[:, d:]

    # bf16 operands for the MXU; all elementwise / EUP math stays f32
    cond_bf = c_ref[...].astype(jnp.bfloat16)

    def coupling(u, v, w1_ref, b1_ref, w2_ref, b2_ref):
        # transform v given (u, cond); single K=512 matmul via concat
        inp = jnp.concatenate([u.astype(jnp.bfloat16), cond_bf], axis=1)
        h = jnp.dot(inp, w1_ref[...], preferred_element_type=jnp.float32)
        h = jnp.maximum(h + b1_ref[...], 0.0)
        st = jnp.dot(h.astype(jnp.bfloat16), w2_ref[...],
                     preferred_element_type=jnp.float32) + b2_ref[...]
        s = CLAMP * jnp.tanh(st[:, :d] * INV_CLAMP)
        t = st[:, d:]
        v_new = v * jnp.exp(s) + t
        lj = jnp.sum(s, axis=1, keepdims=True)
        return v_new, lj

    xb, lj1 = coupling(xa, xb, w1a_ref, b1a_ref, w2a_ref, b2a_ref)
    xa, lj2 = coupling(xb, xa, w1b_ref, b1b_ref, w2b_ref, b2b_ref)

    jac = lj1 + lj2                                           # [B, 1]
    zz = (jnp.sum(xa * xa, axis=1, keepdims=True)
          + jnp.sum(xb * xb, axis=1, keepdims=True))          # [B, 1]

    lane = jax.lax.broadcasted_iota(jnp.int32, out_ref.shape, 1)
    out_ref[...] = jnp.where(lane == 0, zz,
                             jnp.where(lane == 1, jac, 0.0))


def fused_forward(x_ab_flat, noise_flat, cond_flat, params):
    (w1a, b1a, w2a, b2a), (w1b, b1b, w2b, b2b) = params
    Bp = x_ab_flat.shape[0]
    return pl.pallas_call(
        _fused_forward_kernel,
        out_shape=jax.ShapeDtypeStruct((Bp, 128), jnp.float32),
        in_specs=[_vmem_spec()] * 11,
        out_specs=_vmem_spec(),
    )(x_ab_flat, noise_flat, cond_flat,
      w1a, b1a, w2a, b2a, w1b, b1b, w2b, b2b)


# ----------------------------------------------------------------------------
# WrappedModel.forward
# ----------------------------------------------------------------------------
def wrapped_model_forward(x, noise, params):
    B = x.shape[0]
    x_l = x[:, 0:1]                      # [B, 1, H, W]
    x_ab = x[:, 1:]                      # [B, 2, H, W]

    # F.interpolate(x_ab, size=c.img_dims), mode='nearest'.
    # Short-circuit when already at target size (statically true here).
    Hin, Win = x_ab.shape[2], x_ab.shape[3]
    Hout, Wout = IMG_DIMS
    if (Hin, Win) != (Hout, Wout):
        hi = (jnp.arange(Hout) * Hin) // Hout      # integer math, no fp rounding
        wi = (jnp.arange(Wout) * Win) // Wout
        x_ab = x_ab[:, :, hi, :][:, :, :, wi]

    x_ab_flat = x_ab.reshape(B, -1).astype(jnp.float32)
    noise_flat = noise.reshape(B, -1).astype(jnp.float32)
    cond_flat = x_l.reshape(B, -1).astype(jnp.float32)

    # Pad the batch to a sublane multiple of 8 (vreg/MXU row utilization);
    # padded rows are sliced off the outputs below.
    B_pad = max(8, ((B + 7) // 8) * 8)
    if B_pad != B:
        pad = lambda a: jnp.pad(a, ((0, B_pad - B), (0, 0)))
        x_ab_flat, noise_flat, cond_flat = (
            pad(x_ab_flat), pad(noise_flat), pad(cond_flat))

    out = fused_forward(x_ab_flat, noise_flat, cond_flat, params)  # [B_pad,128]
    zz = out[:B, 0]
    jac = out[:B, 1]
    return zz, jac


# ----------------------------------------------------------------------------
# Deterministic parameter init (synthetic INN coupling subnetworks).
# W1x / W1c are stacked into one [d_half + d_cond, hidden] matrix so the
# kernel does a single K=512 matmul; matmul weights are stored in bf16.
# ----------------------------------------------------------------------------
def init_params(key, d_half, d_cond, hidden):
    ks = jax.random.split(key, 6)

    def block(k0, k1, k2):
        w1x = 0.05 * jax.random.normal(k0, (d_half, hidden), jnp.float32)
        w1c = 0.05 * jax.random.normal(k1, (d_cond, hidden), jnp.float32)
        w1 = jnp.concatenate([w1x, w1c], axis=0).astype(jnp.bfloat16)
        b1 = jnp.zeros((1, hidden), jnp.float32)
        w2 = (0.05 * jax.random.normal(
            k2, (hidden, 2 * d_half), jnp.float32)).astype(jnp.bfloat16)
        b2 = jnp.zeros((1, 2 * d_half), jnp.float32)
        return (w1, b1, w2, b2)

    return [block(ks[0], ks[1], ks[2]), block(ks[3], ks[4], ks[5])]


if __name__ == "__main__":
    key = jax.random.PRNGKey(0)
    kx, kn, kp = jax.random.split(key, 3)

    B, H, W = 2, 16, 16
    x = jax.random.normal(kx, (B, 3, H, W), jnp.float32)          # Lab image
    # torch .normal_() replaced by a deterministic standard-normal draw
    noise = jax.random.normal(kn, (B, 2, IMG_DIMS[0], IMG_DIMS[1]), jnp.float32)

    d_total = 2 * IMG_DIMS[0] * IMG_DIMS[1]      # 512
    d_half = d_total // 2                        # 256
    d_cond = 1 * H * W                           # 256
    params = init_params(kp, d_half, d_cond, hidden=128)

    fwd = jax.jit(functools.partial(wrapped_model_forward, params=params))
    zz, jac = fwd(x, noise)
    jax.block_until_ready((zz, jac))

    assert zz.shape == (B,) and jac.shape == (B,)
    assert bool(jnp.all(jnp.isfinite(zz))) and bool(jnp.all(jnp.isfinite(jac)))
    print("KERNEL_OK")
</pallas_src>

<mosaic_0001>
module attributes {stable_mosaic.version = 11 : i64} {
  func.func @_fused_forward_kernel(%arg0: memref<8x512xf32, #tpu.memory_space<vmem>>, %arg1: memref<8x512xf32, #tpu.memory_space<vmem>>, %arg2: memref<8x256xf32, #tpu.memory_space<vmem>>, %arg3: memref<512x128xbf16, #tpu.memory_space<vmem>>, %arg4: memref<1x128xf32, #tpu.memory_space<vmem>>, %arg5: memref<128x512xbf16, #tpu.memory_space<vmem>>, %arg6: memref<1x512xf32, #tpu.memory_space<vmem>>, %arg7: memref<512x128xbf16, #tpu.memory_space<vmem>>, %arg8: memref<1x128xf32, #tpu.memory_space<vmem>>, %arg9: memref<128x512xbf16, #tpu.memory_space<vmem>>, %arg10: memref<1x512xf32, #tpu.memory_space<vmem>>, %arg11: memref<8x128xf32, #tpu.memory_space<vmem>>) attributes {dimension_semantics = [], scalar_prefetch = 0 : i64, scratch_operands = 0 : i64, tpu.core_type = #tpu.core_type<tc>} {
    %c0 = arith.constant 0 : index
    %c0_0 = arith.constant 0 : index
    %0 = vector.load %arg0[%c0, %c0_0] : memref<8x512xf32, #tpu.memory_space<vmem>>, vector<8x512xf32>
    %c0_1 = arith.constant 0 : index
    %c0_2 = arith.constant 0 : index
    %1 = vector.load %arg1[%c0_1, %c0_2] : memref<8x512xf32, #tpu.memory_space<vmem>>, vector<8x512xf32>
    %cst = arith.constant 5.000000e-02 : f32
    %2 = vector.broadcast %cst : f32 to vector<8x512xf32>
    %3 = arith.mulf %2, %1 : vector<8x512xf32>
    %4 = arith.addf %0, %3 : vector<8x512xf32>
    %5 = vector.extract_strided_slice %4 {offsets = [0, 0], sizes = [8, 256], strides = [1, 1]} : vector<8x512xf32> to vector<8x256xf32>
    %6 = vector.extract_strided_slice %4 {offsets = [0, 256], sizes = [8, 256], strides = [1, 1]} : vector<8x512xf32> to vector<8x256xf32>
    %c0_3 = arith.constant 0 : index
    %c0_4 = arith.constant 0 : index
    %7 = vector.load %arg2[%c0_3, %c0_4] : memref<8x256xf32, #tpu.memory_space<vmem>>, vector<8x256xf32>
    %8 = arith.truncf %7 : vector<8x256xf32> to vector<8x256xbf16>
    %9 = arith.truncf %5 : vector<8x256xf32> to vector<8x256xbf16>
    %10 = tpu.concatenate %9, %8 in 1 : vector<8x256xbf16>, vector<8x256xbf16> -> vector<8x512xbf16>
    %c0_5 = arith.constant 0 : index
    %c0_6 = arith.constant 0 : index
    %11 = vector.load %arg3[%c0_5, %c0_6] : memref<512x128xbf16, #tpu.memory_space<vmem>>, vector<512x128xbf16>
    %cst_7 = arith.constant dense<0.000000e+00> : vector<8x128xf32>
    %12 = tpu.matmul %10, %11, %cst_7 {dimension_numbers = #tpu.dot_dimension_numbers<[1], [0], [0], [1], [0, 0, 1, 1], [], []>} : vector<8x512xbf16>, vector<512x128xbf16>, vector<8x128xf32> -> vector<8x128xf32>
    %c0_8 = arith.constant 0 : index
    %c0_9 = arith.constant 0 : index
    %13 = vector.load %arg4[%c0_8, %c0_9] : memref<1x128xf32, #tpu.memory_space<vmem>>, vector<1x128xf32>
    %14 = vector.broadcast %13 : vector<1x128xf32> to vector<8x128xf32>
    %15 = arith.addf %12, %14 : vector<8x128xf32>
    %cst_10 = arith.constant 0.000000e+00 : f32
    %16 = vector.broadcast %cst_10 : f32 to vector<8x128xf32>
    %17 = arith.maximumf %15, %16 : vector<8x128xf32>
    %18 = arith.truncf %17 : vector<8x128xf32> to vector<8x128xbf16>
    %c0_11 = arith.constant 0 : index
    %c0_12 = arith.constant 0 : index
    %19 = vector.load %arg5[%c0_11, %c0_12] : memref<128x512xbf16, #tpu.memory_space<vmem>>, vector<128x512xbf16>
    %cst_13 = arith.constant dense<0.000000e+00> : vector<8x512xf32>
    %20 = tpu.matmul %18, %19, %cst_13 {dimension_numbers = #tpu.dot_dimension_numbers<[1], [0], [0], [1], [0, 0, 1, 1], [], []>} : vector<8x128xbf16>, vector<128x512xbf16>, vector<8x512xf32> -> vector<8x512xf32>
    %c0_14 = arith.constant 0 : index
    %c0_15 = arith.constant 0 : index
    %21 = vector.load %arg6[%c0_14, %c0_15] : memref<1x512xf32, #tpu.memory_space<vmem>>, vector<1x512xf32>
    %22 = vector.broadcast %21 : vector<1x512xf32> to vector<8x512xf32>
    %23 = arith.addf %20, %22 : vector<8x512xf32>
    %24 = vector.extract_strided_slice %23 {offsets = [0, 0], sizes = [8, 256], strides = [1, 1]} : vector<8x512xf32> to vector<8x256xf32>
    %cst_16 = arith.constant 0.526315808 : f32
    %25 = vector.broadcast %cst_16 : f32 to vector<8x256xf32>
    %26 = arith.mulf %24, %25 : vector<8x256xf32>
    %27 = math.tanh %26 : vector<8x256xf32>
    %cst_17 = arith.constant 1.900000e+00 : f32
    %28 = vector.broadcast %cst_17 : f32 to vector<8x256xf32>
    %29 = arith.mulf %28, %27 : vector<8x256xf32>
    %30 = vector.extract_strided_slice %23 {offsets = [0, 256], sizes = [8, 256], strides = [1, 1]} : vector<8x512xf32> to vector<8x256xf32>
    %31 = math.exp %29 : vector<8x256xf32>
    %32 = arith.mulf %6, %31 : vector<8x256xf32>
    %33 = arith.addf %32, %30 : vector<8x256xf32>
    %cst_18 = arith.constant dense<0.000000e+00> : vector<8xf32>
    %34 = vector.multi_reduction <add>, %29, %cst_18 [1] : vector<8x256xf32> to vector<8xf32>
    %35 = vector.shape_cast %34 : vector<8xf32> to vector<8x1xf32>
    %36 = arith.truncf %33 : vector<8x256xf32> to vector<8x256xbf16>
    %37 = tpu.concatenate %36, %8 in 1 : vector<8x256xbf16>, vector<8x256xbf16> -> vector<8x512xbf16>
    %c0_19 = arith.constant 0 : index
    %c0_20 = arith.constant 0 : index
    %38 = vector.load %arg7[%c0_19, %c0_20] : memref<512x128xbf16, #tpu.memory_space<vmem>>, vector<512x128xbf16>
    %cst_21 = arith.constant dense<0.000000e+00> : vector<8x128xf32>
    %39 = tpu.matmul %37, %38, %cst_21 {dimension_numbers = #tpu.dot_dimension_numbers<[1], [0], [0], [1], [0, 0, 1, 1], [], []>} : vector<8x512xbf16>, vector<512x128xbf16>, vector<8x128xf32> -> vector<8x128xf32>
    %c0_22 = arith.constant 0 : index
    %c0_23 = arith.constant 0 : index
    %40 = vector.load %arg8[%c0_22, %c0_23] : memref<1x128xf32, #tpu.memory_space<vmem>>, vector<1x128xf32>
    %41 = vector.broadcast %40 : vector<1x128xf32> to vector<8x128xf32>
    %42 = arith.addf %39, %41 : vector<8x128xf32>
    %cst_24 = arith.constant 0.000000e+00 : f32
    %43 = vector.broadcast %cst_24 : f32 to vector<8x128xf32>
    %44 = arith.maximumf %42, %43 : vector<8x128xf32>
    %45 = arith.truncf %44 : vector<8x128xf32> to vector<8x128xbf16>
    %c0_25 = arith.constant 0 : index
    %c0_26 = arith.constant 0 : index
    %46 = vector.load %arg9[%c0_25, %c0_26] : memref<128x512xbf16, #tpu.memory_space<vmem>>, vector<128x512xbf16>
    %cst_27 = arith.constant dense<0.000000e+00> : vector<8x512xf32>
    %47 = tpu.matmul %45, %46, %cst_27 {dimension_numbers = #tpu.dot_dimension_numbers<[1], [0], [0], [1], [0, 0, 1, 1], [], []>} : vector<8x128xbf16>, vector<128x512xbf16>, vector<8x512xf32> -> vector<8x512xf32>
    %c0_28 = arith.constant 0 : index
    %c0_29 = arith.constant 0 : index
    %48 = vector.load %arg10[%c0_28, %c0_29] : memref<1x512xf32, #tpu.memory_space<vmem>>, vector<1x512xf32>
    %49 = vector.broadcast %48 : vector<1x512xf32> to vector<8x512xf32>
    %50 = arith.addf %47, %49 : vector<8x512xf32>
    %51 = vector.extract_strided_slice %50 {offsets = [0, 0], sizes = [8, 256], strides = [1, 1]} : vector<8x512xf32> to vector<8x256xf32>
    %cst_30 = arith.constant 0.526315808 : f32
    %52 = vector.broadcast %cst_30 : f32 to vector<8x256xf32>
    %53 = arith.mulf %51, %52 : vector<8x256xf32>
    %54 = math.tanh %53 : vector<8x256xf32>
    %cst_31 = arith.constant 1.900000e+00 : f32
    %55 = vector.broadcast %cst_31 : f32 to vector<8x256xf32>
    %56 = arith.mulf %55, %54 : vector<8x256xf32>
    %57 = vector.extract_strided_slice %50 {offsets = [0, 256], sizes = [8, 256], strides = [1, 1]} : vector<8x512xf32> to vector<8x256xf32>
    %58 = math.exp %56 : vector<8x256xf32>
    %59 = arith.mulf %5, %58 : vector<8x256xf32>
    %60 = arith.addf %59, %57 : vector<8x256xf32>
    %cst_32 = arith.constant dense<0.000000e+00> : vector<8xf32>
    %61 = vector.multi_reduction <add>, %56, %cst_32 [1] : vector<8x256xf32> to vector<8xf32>
    %62 = vector.shape_cast %61 : vector<8xf32> to vector<8x1xf32>
    %63 = arith.addf %35, %62 : vector<8x1xf32>
    %64 = arith.mulf %60, %60 : vector<8x256xf32>
    %cst_33 = arith.constant dense<0.000000e+00> : vector<8xf32>
    %65 = vector.multi_reduction <add>, %64, %cst_33 [1] : vector<8x256xf32> to vector<8xf32>
    %66 = vector.shape_cast %65 : vector<8xf32> to vector<8x1xf32>
    %67 = arith.mulf %33, %33 : vector<8x256xf32>
    %cst_34 = arith.constant dense<0.000000e+00> : vector<8xf32>
    %68 = vector.multi_reduction <add>, %67, %cst_34 [1] : vector<8x256xf32> to vector<8xf32>
    %69 = vector.shape_cast %68 : vector<8xf32> to vector<8x1xf32>
    %70 = arith.addf %66, %69 : vector<8x1xf32>
    %71 = tpu.iota {dimensions = array<i32: 1>} : vector<8x128xi32>
    %c0_i32 = arith.constant 0 : i32
    %72 = vector.broadcast %c0_i32 : i32 to vector<8x128xi32>
    %73 = arith.cmpi eq, %71, %72 : vector<8x128xi32>
    %c1_i32 = arith.constant 1 : i32
    %74 = vector.broadcast %c1_i32 : i32 to vector<8x128xi32>
    %75 = arith.cmpi eq, %71, %74 : vector<8x128xi32>
    %cst_35 = arith.constant 0.000000e+00 : f32
    %76 = vector.shape_cast %63 : vector<8x1xf32> to vector<8x1xf32>
    %77 = vector.broadcast %76 : vector<8x1xf32> to vector<8x128xf32>
    %78 = vector.broadcast %cst_35 : f32 to vector<8x128xf32>
    %79 = arith.select %75, %77, %78 : vector<8x128xi1>, vector<8x128xf32>
    %80 = vector.shape_cast %70 : vector<8x1xf32> to vector<8x1xf32>
    %81 = vector.broadcast %80 : vector<8x1xf32> to vector<8x128xf32>
    %82 = arith.select %73, %81, %79 : vector<8x128xi1>, vector<8x128xf32>
    %c0_36 = arith.constant 0 : index
    %c0_37 = arith.constant 0 : index
    %83 = vector.load %arg11[%c0_36, %c0_37] : memref<8x128xf32, #tpu.memory_space<vmem>>, vector<8x128xf32>
    tpu.vector_store %arg11[%c0_36, %c0_37], %82 {strides = array<i32>} : memref<8x128xf32, #tpu.memory_space<vmem>>, vector<8x128xf32>,
    return
  }
}

</mosaic_0001>

<bundles_post_ra>
// kernel: wrapped_model_forward.1
= control target key start
LH: loop header
LB: loop body
LE: loop exit
PB: predicated region body
PF: predicated region fallthrough
CT: control target
= control target key end

     0   :  { %16 = vsyncpa [#allocation3], 0  ;;  %s2178_s0 = inlined_call_operand.vmem [shape: f32[8,512], index: 0, kind: input, shape index: {}]   ;;  %s2179_s1 = inlined_call_operand.vmem [shape: f32[8,512], index: 1, kind: input, shape index: {}]   ;;  %s2180_s2 = inlined_call_operand.vmem [shape: f32[8,256], index: 2, kind: input, shape index: {}]   ;;  %s2181_s3 = inlined_call_operand.hbm [shape: bf16[512,128], index: 3, kind: input, shape index: {}]   ;;  %s2182_s4 = inlined_call_operand.vmem [shape: f32[1,128], index: 4, kind: input, shape index: {}, may-alias: {4,8}]   ;;  %s2183_s5 = inlined_call_operand.vmem [shape: bf16[128,512], index: 5, kind: input, shape index: {}]   ;;  %s2184_s6 = inlined_call_operand.vmem [shape: f32[1,512], index: 6, kind: input, shape index: {}, may-alias: {6,10}]   ;;  %s2185_s7 = inlined_call_operand.hbm [shape: bf16[512,128], index: 7, kind: input, shape index: {}]   ;;  %s2186_s8 = inlined_call_operand.vmem [shape: f32[1,128], index: 8, kind: input, shape index: {}, may-alias: {4,8}]   ;;  %s2187_s9 = inlined_call_operand.hbm [shape: bf16[128,512], index: 9, kind: input, shape index: {}]   ;;  %s2188_s10 = inlined_call_operand.vmem [shape: f32[1,512], index: 10, kind: input, shape index: {}, may-alias: {6,10}]   ;;  %s2189_s11 = inlined_call_operand.vmem [shape: f32[8,128], index: 11, kind: output, shape index: {}]  }
   0x1   :  { %17 = vsyncpa [#allocation5], 0  ;;  %s1911_s17 = smov [#allocation4]   ;;  %s1912_s19 = smov [#allocation2]  }
   0x2   :  { %s47_s18 = sshll.u32 %s1911_s17, 4  ;;  %s29_s20 = sshll.u32 %s1912_s19, 4  ;;  %s48_s18 = int_to_ptr.vmem [resolvable:$true] %s47_s18  ;;  %s30_s20 = int_to_ptr.vmem [resolvable:$true] %s29_s20 }
   0x3   :  { %s1855_s21 = scalar_lea.vmem %s48_s18, 4096  ;;  %p1860_p1 = scmp.lt.s32.totalorder %s48_s18, %s48_s18 }
   0x4   :  { %p1856_p0 = scmp.ne.s32.totalorder %s48_s18, %s1855_s21  ;;  %p1861_p2 = scmp.lt.s32.totalorder %s1855_s21, %s1855_s21 }
   0x6   :  { %p1862_p3 = por %p1861_p2, %p1860_p1 }
   0x8   :  { %p1863_p4 = pnand %p1862_p3, %p1856_p0 }
   0xa   :  { %1866 = shalt.err (!%p1863_p4)
}
   0xb   :  { %s1913_s22 = smov 64   ;;  %s1914_s23 = smov 4  }
   0xc   :  { %53 = dma.hbm_to_vmem [thread:$0]  %s2185_s7, 4096, %s48_s18, [#allocation5], %s1913_s22, %s1913_s22, %s1914_s23  }
   0xd   :  { %s1875_s26 = scalar_lea.vmem %s30_s20, 4096  ;;  %p1880_p6 = scmp.lt.s32.totalorder %s30_s20, %s30_s20 }
   0xe   :  { %p1876_p5 = scmp.ne.s32.totalorder %s30_s20, %s1875_s26  ;;  %p1881_p7 = scmp.lt.s32.totalorder %s1875_s26, %s1875_s26 }
  0x10   :  { %p1882_p8 = por %p1881_p7, %p1880_p6 }
  0x12   :  { %p1883_p9 = pnand %p1882_p8, %p1876_p5 }
  0x14   :  { %1886 = shalt.err (!%p1883_p9)
}
  0x15   :  { %35 = dma.hbm_to_vmem [thread:$0]  %s2181_s3, 4096, %s30_s20, [#allocation3], %s1913_s22, %s1913_s22, %s1914_s23  }
  0x16   :  { %s1915_s29 = smov [#allocation6]  }
  0x17   :  { %s61_s30 = sshll.u32 %s1915_s29, 4  ;;  %s62_s30 = int_to_ptr.vmem [resolvable:$true] %s61_s30 }
  0x18   :  { %s1895_s12 = scalar_lea.vmem %s62_s30, 4096  ;;  %p1900_p11 = scmp.lt.s32.totalorder %s62_s30, %s62_s30 }
  0x19   :  { %p1896_p10 = scmp.ne.s32.totalorder %s62_s30, %s1895_s12  ;;  %p1901_p12 = scmp.lt.s32.totalorder %s1895_s12, %s1895_s12 }
  0x1b   :  { %p1902_p13 = por %p1901_p12, %p1900_p11 }
  0x1d   :  { %p1903_p0 = pnand %p1902_p13, %p1896_p10 }
  0x1f   :  { %1906 = shalt.err (!%p1903_p0)
}
  0x20   :  { %s1916_s7 = smov 256   ;;  %s1917_s13 = smov 16  }
  0x21   :  { %67 = dma.hbm_to_vmem [thread:$0]  %s2187_s9, 4096, %s62_s30, [#allocation5], %s1916_s7, %s1916_s7, %s1917_s13  }
  0x22   :  { %1907 = dma.done.wait [#allocation3], 4096  }
  0x23   :  { %1908 = vsyncadd [#allocation3], 4294963200 }
  0x24   :  { %1909 = dma.done.wait [#allocation5], 8192  }
  0x25   :  { %1910 = vsyncadd [#allocation5], 4294959104  ;;  %v1671_v0 = vld [vmem:[#allocation2 + $0x78] sm:$0xff]   ;;  %v1675_v4 = vld [vmem:[#allocation2 + $0x70] sm:$0xff]  }
  0x26   :  { %v1672_v1 = vld [vmem:[#allocation2 + $0xf8] sm:$0xff]   ;;  %1575 = vmatprep.subr.bf16.mxu0 %v1671_v0  ;;  %v1676_v5 = vld [vmem:[#allocation2 + $0xf0] sm:$0xff]   ;;  %v1679_v8 = vld [vmem:[#allocation2 + $0x68] sm:$0xff]  }
  0x27   :  { %v1673_v2 = vld [vmem:[#allocation2 + $0x38] sm:$0xff]   ;;  %1597 = vmatprep.subr.bf16.mxu1 %v1672_v1  ;;  %v1677_v6 = vld [vmem:[#allocation2 + $0x30] sm:$0xff]   ;;  %v1680_v9 = vld [vmem:[#allocation2 + $0xe8] sm:$0xff]  }
  0x28   :  { %v1674_v3 = vld [vmem:[#allocation2 + $0xb8] sm:$0xff]   ;;  %1576 = vmatpush3.bf16.msra.mxu0 %v1673_v2  ;;  %v1678_v7 = vld [vmem:[#allocation2 + $0xb0] sm:$0xff]   ;;  %v1681_v10 = vld [vmem:[#allocation2 + $0x28] sm:$0xff]  }
  0x29   :  { %1598 = vmatpush3.bf16.msra.mxu1 %v1674_v3  ;;  %1577 = vmatprep.subr.bf16.mxu0 %v1675_v4  ;;  %v1682_v11 = vld [vmem:[#allocation2 + $0xa8] sm:$0xff]   ;;  %v1683_v12 = vld [vmem:[#allocation2 + $0x60] sm:$0xff]   ;;  %v1687_v16 = vld [vmem:[#allocation2 + $0x58] sm:$0xff]  }
  0x2a   :  { %1599 = vmatprep.subr.bf16.mxu1 %v1676_v5  ;;  %v1684_v13 = vld [vmem:[#allocation2 + $0xe0] sm:$0xff]   ;;  %v1688_v17 = vld [vmem:[#allocation2 + $0xd8] sm:$0xff]   ;;  %v1691_v20 = vld [vmem:[#allocation2 + $0x50] sm:$0xff]  }
  0x2b   :  { %v1685_v14 = vld [vmem:[#allocation2 + $0x20] sm:$0xff]   ;;  %v1689_v18 = vld [vmem:[#allocation2 + $0x18] sm:$0xff]   ;;  %v1692_v21 = vld [vmem:[#allocation2 + $0xd0] sm:$0xff]  }
  0x2c   :  { %1578 = vmatpush3.bf16.msra.mxu0 %v1677_v6  ;;  %v1686_v15 = vld [vmem:[#allocation2 + $0xa0] sm:$0xff]   ;;  %v1690_v19 = vld [vmem:[#allocation2 + $0x98] sm:$0xff]   ;;  %v1693_v22 = vld [vmem:[#allocation2 + $0x10] sm:$0xff]  }
  0x2d   :  { %1600 = vmatpush3.bf16.msra.mxu1 %v1678_v7  ;;  %1579 = vmatprep.subr.bf16.mxu0 %v1679_v8  ;;  %v1694_v23 = vld [vmem:[#allocation2 + $0x90] sm:$0xff]   ;;  %v1695_v24 = vld [vmem:[#allocation2 + $0x48] sm:$0xff]   ;;  %v1699_v28 = vld [vmem:[#allocation2 + $0x40] sm:$0xff]  }
  0x2e   :  { %1601 = vmatprep.subr.bf16.mxu1 %v1680_v9  ;;  %v1696_v25 = vld [vmem:[#allocation2 + $0xc8] sm:$0xff]   ;;  %v1700_v29 = vld [vmem:[#allocation2 + $0xc0] sm:$0xff]  }
  0x2f   :  { %v1697_v26 = vld [vmem:[#allocation2 + $0x8] sm:$0xff]   ;;  %v1701_v30 = vld [vmem:[#allocation2] sm:$0xff]  }
  0x30   :  { %1580 = vmatpush3.bf16.msra.mxu0 %v1681_v10  ;;  %v1698_v27 = vld [vmem:[#allocation2 + $0x88] sm:$0xff]   ;;  %v1702_v31 = vld [vmem:[#allocation2 + $0x80] sm:$0xff]  }
  0x31   :  { %1602 = vmatpush3.bf16.msra.mxu1 %v1682_v11  ;;  %1581 = vmatprep.subr.bf16.mxu0 %v1683_v12  ;;  %v81_v32 = vld [vmem:[%s2178_s0 + $0x8] sm:$0xff]  ;;  %v80_v37 = vld [vmem:[%s2178_s0] sm:$0xff] }
  0x32   :  { %1603 = vmatprep.subr.bf16.mxu1 %v1684_v13  ;;  %v85_v33 = vld [vmem:[%s2179_s1 + $0x8] sm:$0xff]  ;;  %v84_v38 = vld [vmem:[%s2179_s1] sm:$0xff] }
  0x33   :  { %v97_v34 = vld [vmem:[%s2180_s2 + $0x8] sm:$0xff]  ;;  %v89_v35 = vmul.f32 0.05, %v85_v33  ;;  %v96_v39 = vld [vmem:[%s2180_s2] sm:$0xff]  ;;  %v88_v40 = vmul.f32 0.05, %v84_v38 }
  0x34   :  { %1582 = vmatpush3.bf16.msra.mxu0 %v1685_v14  ;;  %v1997_v36 = vpack.c.bf16 %v97_v34, %v97_v34  ;;  %v2008_v41 = vpack.c.bf16 %v96_v39, %v96_v39  ;;  %v1705_v43 = vld [vmem:[%s2183_s5 + $0xe4] ss:$16 sps:$4 sm:$0xff]   ;;  %v1706_v45 = vld [vmem:[%s2183_s5 + $0xe8] ss:$16 sps:$4 sm:$0xff]   ;;  %v1708_v46 = vld [vmem:[%s2183_s5 + $0xec] ss:$16 sps:$4 sm:$0xff]  }
  0x35   :  { %1604 = vmatpush3.bf16.msra.mxu1 %v1686_v15  ;;  %1583 = vmatprep.subr.bf16.mxu0 %v1687_v16  ;;  %v2010_v42 = vadd.f32 %v89_v35, %v81_v32  ;;  %v2016_v44 = vadd.f32 %v88_v40, %v80_v37  ;;  %v1703_v48 = vld [vmem:[%s2183_s5 + $0xe0] ss:$16 sps:$4 sm:$0xff]   ;;  %v1711_v49 = vld [vmem:[%s2183_s5 + $0xc4] ss:$16 sps:$4 sm:$0xff]   ;;  %v1712_v51 = vld [vmem:[%s2183_s5 + $0xc8] ss:$16 sps:$4 sm:$0xff]  }
  0x36   :  { %1605 = vmatprep.subr.bf16.mxu1 %v1688_v17  ;;  %437 = vmatprep.mubr.bf16.mxu1 %v1997_v36  ;;  %v1714_v52 = vld [vmem:[%s2183_s5 + $0xcc] ss:$16 sps:$4 sm:$0xff]   ;;  %v1709_v53 = vld [vmem:[%s2183_s5 + $0xc0] ss:$16 sps:$4 sm:$0xff]   ;;  %v1717_v55 = vld [vmem:[%s2183_s5 + $0xa4] ss:$16 sps:$4 sm:$0xff]  }
  0x37   :  { %v101_v47 = vpack.c.bf16 %v2010_v42, %v2010_v42  ;;  %v100_v50 = vpack.c.bf16 %v2016_v44, %v2016_v44  ;;  %v1720_v54 = vld [vmem:[%s2183_s5 + $0xac] ss:$16 sps:$4 sm:$0xff]   ;;  %v1718_v56 = vld [vmem:[%s2183_s5 + $0xa8] ss:$16 sps:$4 sm:$0xff]   ;;  %v1715_v58 = vld [vmem:[%s2183_s5 + $0xa0] ss:$16 sps:$4 sm:$0xff]  }
  0x38   :  { %1584 = vmatpush3.bf16.msra.mxu0 %v1689_v18  ;;  %v1726_v57 = vld [vmem:[%s2183_s5 + $0x8c] ss:$16 sps:$4 sm:$0xff]   ;;  %v1723_v59 = vld [vmem:[%s2183_s5 + $0x84] ss:$16 sps:$4 sm:$0xff]   ;;  %v1724_v60 = vld [vmem:[%s2183_s5 + $0x88] ss:$16 sps:$4 sm:$0xff]  }
  0x39   :  { %1606 = vmatpush3.bf16.msra.mxu1 %v1690_v19  ;;  %1585 = vmatprep.subr.bf16.mxu0 %v1691_v20  ;;  %v1721_v61 = vld [vmem:[%s2183_s5 + $0x80] ss:$16 sps:$4 sm:$0xff]   ;;  %v1732_v62 = vld [vmem:[%s2183_s5 + $0x6c] ss:$16 sps:$4 sm:$0xff]   ;;  %v1729_v63 = vld [vmem:[%s2183_s5 + $0x64] ss:$16 sps:$4 sm:$0xff]  }
  0x3a   :  { %1607 = vmatprep.subr.bf16.mxu1 %v1692_v21  ;;  %397 = vmatprep.mubr.bf16.mxu0 %v101_v47  ;;  %v1730_v0 = vld [vmem:[%s2183_s5 + $0x68] ss:$16 sps:$4 sm:$0xff]   ;;  %v1727_v1 = vld [vmem:[%s2183_s5 + $0x60] ss:$16 sps:$4 sm:$0xff]   ;;  %v1735_v2 = vld [vmem:[%s2183_s5 + $0x44] ss:$16 sps:$4 sm:$0xff]  }
  0x3b   :  { %v1738_v3 = vld [vmem:[%s2183_s5 + $0x4c] ss:$16 sps:$4 sm:$0xff]   ;;  %v1733_v4 = vld [vmem:[%s2183_s5 + $0x40] ss:$16 sps:$4 sm:$0xff]   ;;  %v1736_v5 = vld [vmem:[%s2183_s5 + $0x48] ss:$16 sps:$4 sm:$0xff]  }
  0x3c   :  { %1586 = vmatpush3.bf16.msra.mxu0 %v1693_v22  ;;  %v1741_v6 = vld [vmem:[%s2183_s5 + $0x24] ss:$16 sps:$4 sm:$0xff]   ;;  %v1744_v7 = vld [vmem:[%s2183_s5 + $0x2c] ss:$16 sps:$4 sm:$0xff]   ;;  %v1739_v8 = vld [vmem:[%s2183_s5 + $0x20] ss:$16 sps:$4 sm:$0xff]  }
  0x3d   :  { %1608 = vmatpush3.bf16.msra.mxu1 %v1694_v23  ;;  %1587 = vmatprep.subr.bf16.mxu0 %v1695_v24  ;;  %v1742_v9 = vld [vmem:[%s2183_s5 + $0x28] ss:$16 sps:$4 sm:$0xff]   ;;  %v1747_v10 = vld [vmem:[%s2183_s5 + $0x4] ss:$16 sps:$4 sm:$0xff]   ;;  %v1750_v11 = vld [vmem:[%s2183_s5 + $0xc] ss:$16 sps:$4 sm:$0xff]  }
  0x3e   :  { %1609 = vmatprep.subr.bf16.mxu1 %v1696_v25  ;;  %v1745_v12 = vld [vmem:[%s2183_s5] ss:$16 sps:$4 sm:$0xff]   ;;  %v1748_v13 = vld [vmem:[%s2183_s5 + $0x8] ss:$16 sps:$4 sm:$0xff]   ;;  %v1918_v14 = vmov 0  }
  0x3f   :  { %v1445_v19 = vld [vmem:[%s2182_s4] ss:$0 sm:$0xff]  ;;  %v1753_v32 = vld [vmem:[#allocation4 + $0x78] sm:$0xff]   ;;  %v1754_v33 = vld [vmem:[#allocation4 + $0xf0] sm:$0xff]  }
  0x40   :  { %1588 = vmatpush3.bf16.msra.mxu0 %v1697_v26  ;;  %v1755_v34 = vld [vmem:[#allocation4 + $0x38] sm:$0xff]   ;;  %v1757_v35 = vld [vmem:[#allocation4 + $0x70] sm:$0xff]   ;;  %v1758_v39 = vld [vmem:[#allocation4 + $0xe8] sm:$0xff]  }
  0x41   :  { %1610 = vmatpush3.bf16.msra.mxu1 %v1698_v27  ;;  %1589 = vmatprep.subr.bf16.mxu0 %v1699_v28  ;;  %v1756_v37 = vld [vmem:[#allocation4 + $0xb0] sm:$0xff]   ;;  %v1761_v40 = vld [vmem:[#allocation4 + $0x68] sm:$0xff]   ;;  %v1765_v47 = vld [vmem:[#allocation4 + $0x60] sm:$0xff]  }
  0x42   :  { %1611 = vmatprep.subr.bf16.mxu1 %v1700_v29  ;;  %v1759_v38 = vld [vmem:[#allocation4 + $0x30] sm:$0xff]  }
  0x44   :  { %1590 = vmatpush3.bf16.msra.mxu0 %v1701_v30  ;;  %v1751_v30 = vld [vmem:[#allocation4 + $0xf8] sm:$0xff]  }
  0x45   :  { %1612 = vmatpush3.bf16.msra.mxu1 %v1702_v31  ;;  %661 = vmatprep.subr.bf16.mxu0 %v1705_v43  ;;  %v1752_v31 = vld [vmem:[#allocation4 + $0xb8] sm:$0xff]   ;;  %v1760_v43 = vld [vmem:[#allocation4 + $0xa8] sm:$0xff]  }
  0x46   :  { %702 = vmatprep.subr.bf16.mxu1 %v1708_v46  ;;  %v1764_v46 = vld [vmem:[#allocation4 + $0xa0] sm:$0xff]  }
  0x47   :  { %398 = vmatmul.mubr.bf16.vlgmr.msra.gmra.mxu0 %v100_v50  ;;  %v1768_v50 = vld [vmem:[#allocation4 + $0x98] sm:$0xff]  }
  0x48   :  { %438 = vmatmul.mubr.bf16.vlgmr.msra.gmra.mxu1 %v2008_v41  ;;  %662 = vmatpush1.bf16.msra.mxu0 %v1703_v48  ;;  %v1766_v48 = vld [vmem:[#allocation4 + $0xd8] sm:$0xff]  }
  0x49   :  { %703 = vmatpush1.bf16.msra.mxu1 %v1706_v45  ;;  %663 = vmatprep.subr.bf16.mxu0 %v1711_v49  ;;  %v1762_v45 = vld [vmem:[#allocation4 + $0xe0] sm:$0xff]  }
  0x4a   :  { %704 = vmatprep.subr.bf16.mxu1 %v1714_v52  ;;  %693 = vmatprep.mubr.bf16.mxu0 %v1918_v14  ;;  %v1767_v49 = vld [vmem:[#allocation4 + $0x20] sm:$0xff]   ;;  %v1770_v52 = vld [vmem:[#allocation4 + $0xd0] sm:$0xff]  }
  0x4b   :  { %734 = vmatprep.mubr.bf16.mxu1 %v1918_v14 }
  0x4c   :  { %664 = vmatpush1.bf16.msra.mxu0 %v1709_v53  ;;  %v1771_v53 = vld [vmem:[#allocation4 + $0x18] sm:$0xff]  }
  0x4d   :  { %705 = vmatpush1.bf16.msra.mxu1 %v1712_v51  ;;  %665 = vmatprep.subr.bf16.mxu0 %v1717_v55  ;;  %v1769_v51 = vld [vmem:[#allocation4 + $0x58] sm:$0xff]   ;;  %v1773_v55 = vld [vmem:[#allocation4 + $0x50] sm:$0xff]  }
  0x4e   :  { %706 = vmatprep.subr.bf16.mxu1 %v1720_v54  ;;  %v1772_v54 = vld [vmem:[#allocation4 + $0x90] sm:$0xff]  }
  0x50   :  { %666 = vmatpush1.bf16.msra.mxu0 %v1715_v58  ;;  %v1776_v58 = vld [vmem:[#allocation4 + $0x88] sm:$0xff]  }
  0x51   :  { %707 = vmatpush1.bf16.msra.mxu1 %v1718_v56  ;;  %667 = vmatprep.subr.bf16.mxu0 %v1723_v59  ;;  %v1774_v56 = vld [vmem:[#allocation4 + $0xc8] sm:$0xff]  }
  0x52   :  { %708 = vmatprep.subr.bf16.mxu1 %v1726_v57  ;;  %v1775_v57 = vld [vmem:[#allocation4 + $0x10] sm:$0xff]   ;;  %v1777_v59 = vld [vmem:[#allocation4 + $0x48] sm:$0xff]  }
  0x54   :  { %668 = vmatpush1.bf16.msra.mxu0 %v1721_v61  ;;  %v1779_v61 = vld [vmem:[#allocation4 + $0x8] sm:$0xff]  }
  0x55   :  { %709 = vmatpush1.bf16.msra.mxu1 %v1724_v60  ;;  %669 = vmatprep.subr.bf16.mxu0 %v1729_v63  ;;  %v1778_v60 = vld [vmem:[#allocation4 + $0xc0] sm:$0xff]  }
  0x56   :  { %710 = vmatprep.subr.bf16.mxu1 %v1732_v62  ;;  %v1780_v62 = vld [vmem:[#allocation4 + $0x80] sm:$0xff]  }
  0x57   :  { %v1781_v63 = vld [vmem:[#allocation4 + $0x40] sm:$0xff]  }
  0x58   :  { %670 = vmatpush1.bf16.msra.mxu0 %v1727_v1  ;;  %v481_v1 = vlaneseq }
  0x59   :  { %711 = vmatpush1.bf16.msra.mxu1 %v1730_v0  ;;  %671 = vmatprep.subr.bf16.mxu0 %v1735_v2  ;;  %v1782_v0 = vld [vmem:[#allocation4] sm:$0xff]  }
  0x5a   :  { %712 = vmatprep.subr.bf16.mxu1 %v1738_v3  ;;  %v2125_v2 = vshrl.u32 %v481_v1, 7 }
  0x5c   :  { %672 = vmatpush1.bf16.msra.mxu0 %v1733_v4  ;;  %v483_v3 = vsub.s32 0, %v2125_v2  ;;  %v479_v4 = vld [vmem:[%s2184_s6] sm:$0xf] }
  0x5d   :  { %713 = vmatpush1.bf16.msra.mxu1 %v1736_v5  ;;  %673 = vmatprep.subr.bf16.mxu0 %v1741_v6  ;;  %v487_v5 = vsub.s32 1, %v2125_v2 }
  0x5e   :  { %714 = vmatprep.subr.bf16.mxu1 %v1744_v7  ;;  %v484_v6 = vrot.slane %v479_v4, %v483_v3 }
  0x60   :  { %674 = vmatpush1.bf16.msra.mxu0 %v1739_v8 }
  0x61   :  { %715 = vmatpush1.bf16.msra.mxu1 %v1742_v9  ;;  %675 = vmatprep.subr.bf16.mxu0 %v1747_v10 }
  0x62   :  { %716 = vmatprep.subr.bf16.mxu1 %v1750_v11 }
  0x64   :  { %676 = vmatpush1.bf16.msra.mxu0 %v1745_v12 }
  0x65   :  { %717 = vmatpush1.bf16.msra.mxu1 %v1748_v13  ;;  %1619 = vmatprep.subr.bf16.mxu0 %v1753_v32  ;;  %v495_v32 = vsub.s32 3, %v2125_v2 }
  0x66   :  { %1641 = vmatprep.subr.bf16.mxu1 %v1751_v30 }
 0x107   :  { %v1591_v17 = vpop.f32.mrf.mxu0 }
 0x108   :  { %v1613_v15 = vpop.f32.mrf.mxu1 }
 0x109   :  { %v1592_v20 = vpop.f32.mrf.mxu0 }
 0x10a   :  { %v1614_v16 = vpop.f32.mrf.mxu1  ;;  %v1593_v22 = vadd.f32 %v1592_v20, %v1591_v17 }
 0x10b   :  { %v1594_v23 = vpop.f32.mrf.mxu0  ;;  %v1615_v25 = vadd.f32 %v1614_v16, %v1613_v15 }
 0x10c   :  { %v1616_v18 = vpop.f32.mrf.mxu1  ;;  %v400_v24 = vadd.f32 %v1593_v22, %v1445_v19 }
 0x10d   :  { %v1595_v26 = vpop.f32.mrf.mxu0 }
 0x10e   :  { %v1617_v21 = vpop.f32.mrf.mxu1  ;;  %v440_v27 = vadd.f32 %v1615_v25, %v400_v24 }
 0x110   :  { %v445_v28 = vmax.f32 %v440_v27, 0.0  ;;  %v86_v27 = vld [vmem:[%s2179_s1 + $0x10] sm:$0xff] }
 0x111   :  { %v90_v30 = vmul.f32 0.05, %v86_v27  ;;  %v1827_v27 = vld [vmem:[#allocation6 + $0x4] ss:$16 sps:$4 sm:$0xff]  }
 0x112   :  { %v446_v29 = vpack.c.bf16 %v445_v28, %v445_v28  ;;  %v87_v28 = vld [vmem:[%s2179_s1 + $0x18] sm:$0xff] }
 0x114   :  { %694 = vmatmul.mubr.bf16.vlgmr.msra.gmra.mxu0 %v446_v29  ;;  %735 = vmatmul.mubr.bf16.vlgmr.msra.gmra.mxu1 %v446_v29  ;;  %v491_v29 = vsub.s32 2, %v2125_v2  ;;  %v1433_v2 = vand.u32 127, %v481_v1 }
 0x115   :  { %1097 = vmatprep.mubr.bf16.mxu1 %v1997_v36  ;;  %1642 = vmatpush3.bf16.msra.mxu1 %v1752_v31  ;;  %v1763_v36 = vld [vmem:[#allocation4 + $0x28] sm:$0xff]   ;;  %v82_v31 = vld [vmem:[%s2178_s0 + $0x10] sm:$0xff] }
 0x116   :  { %1620 = vmatpush3.bf16.msra.mxu0 %v1755_v34  ;;  %1643 = vmatprep.subr.bf16.mxu1 %v1754_v33  ;;  %v91_v33 = vmul.f32 0.05, %v87_v28  ;;  %v83_v34 = vld [vmem:[%s2178_s0 + $0x18] sm:$0xff]  ;;  %vm1435_vm0 = vcmp.eq.s32.totalorder %v1433_v2, 1  ;;  %vm1434_vm1 = vcmp.eq.s32.totalorder %v1433_v2, 0 }
 0x117   :  { %1621 = vmatprep.subr.bf16.mxu0 %v1757_v35  ;;  %v492_v35 = vrot.slane %v479_v4, %v491_v29  ;;  %v1830_v28 = vld [vmem:[#allocation6 + $0xc] ss:$16 sps:$4 sm:$0xff]  }
 0x119   :  { %1644 = vmatpush3.bf16.msra.mxu1 %v1756_v37  ;;  %v94_v37 = vadd.f32 %v90_v30, %v82_v31  ;;  %v1825_v30 = vld [vmem:[#allocation6] ss:$16 sps:$4 sm:$0xff]   ;;  %v1828_v31 = vld [vmem:[#allocation6 + $0x8] ss:$16 sps:$4 sm:$0xff]  }
 0x11a   :  { %1622 = vmatpush3.bf16.msra.mxu0 %v1759_v38  ;;  %1645 = vmatprep.subr.bf16.mxu1 %v1758_v39  ;;  %v1785_v38 = vld [vmem:[#allocation6 + $0xe4] ss:$16 sps:$4 sm:$0xff]   ;;  %v1786_v39 = vld [vmem:[#allocation6 + $0xe8] ss:$16 sps:$4 sm:$0xff]  }
 0x11b   :  { %1623 = vmatprep.subr.bf16.mxu0 %v1761_v40  ;;  %v496_v40 = vrot.slane %v479_v4, %v495_v32 }
 0x11d   :  { %1646 = vmatpush3.bf16.msra.mxu1 %v1760_v43  ;;  %v95_v43 = vadd.f32 %v91_v33, %v83_v34  ;;  %v1510_v34 = vld [vmem:[%s2186_s8] ss:$0 sm:$0xff] }
 0x11e   :  { %1624 = vmatpush3.bf16.msra.mxu0 %v1763_v36  ;;  %1647 = vmatprep.subr.bf16.mxu1 %v1762_v45  ;;  %v1788_v36 = vld [vmem:[#allocation6 + $0xec] ss:$16 sps:$4 sm:$0xff]  }
 0x11f   :  { %1625 = vmatprep.subr.bf16.mxu0 %v1765_v47 }
 0x121   :  { %1648 = vmatpush3.bf16.msra.mxu1 %v1764_v46  ;;  %v1794_v46 = vld [vmem:[#allocation6 + $0xcc] ss:$16 sps:$4 sm:$0xff]  }
 0x122   :  { %1649 = vmatprep.subr.bf16.mxu1 %v1766_v48  ;;  %1626 = vmatpush3.bf16.msra.mxu0 %v1767_v49 }
 0x123   :  { %1627 = vmatprep.subr.bf16.mxu0 %v1769_v51 }
 0x125   :  { %1650 = vmatpush3.bf16.msra.mxu1 %v1768_v50  ;;  %v1792_v50 = vld [vmem:[#allocation6 + $0xc8] ss:$16 sps:$4 sm:$0xff]  }
 0x126   :  { %1651 = vmatprep.subr.bf16.mxu1 %v1770_v52  ;;  %1628 = vmatpush3.bf16.msra.mxu0 %v1771_v53 }
 0x127   :  { %1629 = vmatprep.subr.bf16.mxu0 %v1773_v55 }
 0x129   :  { %1652 = vmatpush3.bf16.msra.mxu1 %v1772_v54  ;;  %v1800_v54 = vld [vmem:[#allocation6 + $0xac] ss:$16 sps:$4 sm:$0xff]  }
 0x12a   :  { %1653 = vmatprep.subr.bf16.mxu1 %v1774_v56  ;;  %1630 = vmatpush3.bf16.msra.mxu0 %v1775_v57  ;;  %v1798_v56 = vld [vmem:[#allocation6 + $0xa8] ss:$16 sps:$4 sm:$0xff]  }
 0x12b   :  { %1631 = vmatprep.subr.bf16.mxu0 %v1777_v59  ;;  %v1806_v59 = vld [vmem:[#allocation6 + $0x8c] ss:$16 sps:$4 sm:$0xff]  }
 0x12d   :  { %1654 = vmatpush3.bf16.msra.mxu1 %v1776_v58  ;;  %v1783_v58 = vld [vmem:[#allocation6 + $0xe0] ss:$16 sps:$4 sm:$0xff]  }
 0x12e   :  { %1655 = vmatprep.subr.bf16.mxu1 %v1778_v60  ;;  %1632 = vmatpush3.bf16.msra.mxu0 %v1779_v61 }
 0x12f   :  { %1633 = vmatprep.subr.bf16.mxu0 %v1781_v63  ;;  %v1791_v63 = vld [vmem:[#allocation6 + $0xc4] ss:$16 sps:$4 sm:$0xff]  }
 0x131   :  { %1656 = vmatpush3.bf16.msra.mxu1 %v1780_v62 }
 0x132   :  { %1634 = vmatpush3.bf16.msra.mxu0 %v1782_v0  ;;  %1362 = vmatprep.subr.bf16.mxu1 %v1788_v36 }
 0x133   :  { %1321 = vmatprep.subr.bf16.mxu0 %v1785_v38 }
 0x134   :  { %1098 = vmatmul.mubr.bf16.vlgmr.msra.gmra.mxu1 %v2008_v41  ;;  %v488_v41 = vrot.slane %v479_v4, %v487_v5  ;;  %v1804_v4 = vld [vmem:[#allocation6 + $0x88] ss:$16 sps:$4 sm:$0xff]  }
 0x135   :  { %1394 = vmatprep.mubr.bf16.mxu1 %v1918_v14  ;;  %1363 = vmatpush1.bf16.msra.mxu1 %v1786_v39 }
 0x136   :  { %1364 = vmatprep.subr.bf16.mxu1 %v1794_v46  ;;  %v1139_v46 = vld [vmem:[%s2188_s10] sm:$0xf] }
 0x139   :  { %1365 = vmatpush1.bf16.msra.mxu1 %v1792_v50 }
 0x13a   :  { %1366 = vmatprep.subr.bf16.mxu1 %v1800_v54 }
 0x13d   :  { %1367 = vmatpush1.bf16.msra.mxu1 %v1798_v56 }
 0x13e   :  { %1368 = vmatprep.subr.bf16.mxu1 %v1806_v59 }
 0x141   :  { %1369 = vmatpush1.bf16.msra.mxu1 %v1804_v4 }
 0x1d4   :  { %v695_v7 = vpop.f32.mrf.mxu0  ;;  %v736_v8 = vpop.f32.mrf.mxu1 }
 0x1d5   :  { %v696_v9 = vadd.f32 %v695_v7, %v484_v6  ;;  %v737_v47 = vadd.f32 %v736_v8, %v492_v35  ;;  %v1789_v6 = vld [vmem:[#allocation6 + $0xc0] ss:$16 sps:$4 sm:$0xff]   ;;  %v1797_v7 = vld [vmem:[#allocation6 + $0xa4] ss:$16 sps:$4 sm:$0xff]   ;;  %v1810_v8 = vld [vmem:[#allocation6 + $0x68] ss:$16 sps:$4 sm:$0xff]  }
 0x1d6   :  { %v697_v10 = vpop.f32.mrf.mxu0  ;;  %v738_v11 = vpop.f32.mrf.mxu1 }
 0x1d7   :  { %v743_v12 = vmul.f32 0.5263158, %v696_v9  ;;  %v698_v13 = vadd.f32 %v697_v10, %v488_v41  ;;  %v739_v51 = vadd.f32 %v738_v11, %v496_v40  ;;  %v1812_v41 = vld [vmem:[#allocation6 + $0x6c] ss:$16 sps:$4 sm:$0xff]   ;;  %v1795_v9 = vld [vmem:[#allocation6 + $0xa0] ss:$16 sps:$4 sm:$0xff]  }
 0x1d8   :  { %v699_v15 = vpop.f32.mrf.mxu0  ;;  %v740_v16 = vpop.f32.mrf.mxu1  ;;  %1370 = vmatprep.subr.bf16.mxu1 %v1812_v41  ;;  %v1803_v10 = vld [vmem:[#allocation6 + $0x84] ss:$16 sps:$4 sm:$0xff]   ;;  %v1801_v11 = vld [vmem:[#allocation6 + $0x80] ss:$16 sps:$4 sm:$0xff]   ;;  %v1152_v41 = vrot.slane %v1139_v46, %v491_v29 }
 0x1d9   :  { %1831 = vtanh.f32 %v743_v12  ;;  %v744_v17 = vmul.f32 0.5263158, %v698_v13  ;;  %1371 = vmatpush1.bf16.msra.mxu1 %v1810_v8  ;;  %v1809_v12 = vld [vmem:[#allocation6 + $0x64] ss:$16 sps:$4 sm:$0xff]   ;;  %v1807_v13 = vld [vmem:[#allocation6 + $0x60] ss:$16 sps:$4 sm:$0xff]  }
 0x1da   :  { %v700_v18 = vpop.f32.mrf.mxu0  ;;  %v741_v19 = vpop.f32.mrf.mxu1 }
 0x1db   :  { %1833 = vtanh.f32 %v744_v17  ;;  %v1818_v18 = vld [vmem:[#allocation6 + $0x4c] ss:$16 sps:$4 sm:$0xff]  }
 0x1dc   :  { %1372 = vmatprep.subr.bf16.mxu1 %v1818_v18 }
 0x1e6   :  { %v1832_v20 = vpop.eup %1831 }
 0x1e7   :  { %v747_v21 = vmul.f32 1.9, %v1832_v20  ;;  %v1813_v20 = vld [vmem:[#allocation6 + $0x40] ss:$16 sps:$4 sm:$0xff]  }
 0x1e8   :  { %v1834_v22 = vpop.eup %1833 }
 0x1e9   :  { %v748_v23 = vmul.f32 1.9, %v1834_v22  ;;  %v749_v24 = vmul.f32 1.442695, %v747_v21 }
 0x1eb   :  { %v751_v25 = vmul.f32 1.442695, %v748_v23  ;;  %v757_v26 = vadd.f32 %v748_v23, %v747_v21  ;;  %1835 = vpow2.f32 %v749_v24  ;;  %v1816_v21 = vld [vmem:[#allocation6 + $0x48] ss:$16 sps:$4 sm:$0xff]   ;;  %v1821_v23 = vld [vmem:[#allocation6 + $0x24] ss:$16 sps:$4 sm:$0xff]  }
 0x1ec   :  { %1373 = vmatpush1.bf16.msra.mxu1 %v1816_v21  ;;  %v1824_v24 = vld [vmem:[#allocation6 + $0x2c] ss:$16 sps:$4 sm:$0xff]  }
 0x1ed   :  { %1837 = vpow2.f32 %v751_v25  ;;  %758 = vadd.xlane.f32.xlu0 %v757_v26  ;;  %v1819_v25 = vld [vmem:[#allocation6 + $0x20] ss:$16 sps:$4 sm:$0xff]   ;;  %v1822_v26 = vld [vmem:[#allocation6 + $0x28] ss:$16 sps:$4 sm:$0xff]   ;;  %1374 = vmatprep.subr.bf16.mxu1 %v1824_v24 }
 0x1f0   :  { %1375 = vmatpush1.bf16.msra.mxu1 %v1822_v26 }
 0x1f1   :  { %1376 = vmatprep.subr.bf16.mxu1 %v1830_v28 }
 0x1f4   :  { %v1657_v15 = vpop.f32.mrf.mxu1  ;;  %1377 = vmatpush1.bf16.msra.mxu1 %v1828_v31 }
 0x1f6   :  { %v1658_v16 = vpop.f32.mrf.mxu1 }
 0x1f7   :  { %v1659_v17 = vadd.f32 %v1658_v16, %v1657_v15 }
 0x1f8   :  { %v1836_v45 = vpop.eup %1835  ;;  %v1660_v19 = vpop.f32.mrf.mxu1 }
 0x1f9   :  { %v753_v48 = vmul.f32 %v1836_v45, %v94_v37 }
 0x1fa   :  { %v1838_v49 = vpop.eup %1837  ;;  %v1661_v22 = vpop.f32.mrf.mxu1 }
 0x1fb   :  { %v754_v52 = vmul.f32 %v1838_v49, %v95_v43  ;;  %v755_v53 = vadd.f32 %v753_v48, %v737_v47  ;;  %v1144_v47 = vrot.slane %v1139_v46, %v483_v3  ;;  %v1148_v48 = vrot.slane %v1139_v46, %v487_v5 }
 0x1fd   :  { %v756_v55 = vadd.f32 %v754_v52, %v739_v51  ;;  %v1426_v60 = vmul.f32 %v755_v53, %v755_v53  ;;  %v760_v62 = vpack.c.bf16 %v755_v53, %v755_v53 }
 0x1ff   :  { %v761_v57 = vpack.c.bf16 %v756_v55, %v756_v55  ;;  %v1427_v61 = vmul.f32 %v756_v55, %v756_v55 }
 0x201   :  { %1057 = vmatprep.mubr.bf16.mxu0 %v761_v57  ;;  %v2154_v0 = vadd.f32 %v1427_v61, %v1426_v60 }
 0x202   :  { %1058 = vmatmul.mubr.bf16.vlgmr.msra.gmra.mxu0 %v760_v62 }
 0x203   :  { %1322 = vmatpush1.bf16.msra.mxu0 %v1783_v58  ;;  %1353 = vmatprep.mubr.bf16.mxu0 %v1918_v14  ;;  %v1815_v14 = vld [vmem:[#allocation6 + $0x44] ss:$16 sps:$4 sm:$0xff]  }
 0x204   :  { %1323 = vmatprep.subr.bf16.mxu0 %v1791_v63 }
 0x207   :  { %1324 = vmatpush1.bf16.msra.mxu0 %v1789_v6 }
 0x208   :  { %1325 = vmatprep.subr.bf16.mxu0 %v1797_v7  ;;  %v1156_v7 = vrot.slane %v1139_v46, %v495_v32 }
 0x20b   :  { %1326 = vmatpush1.bf16.msra.mxu0 %v1795_v9 }
 0x20c   :  { %1327 = vmatprep.subr.bf16.mxu0 %v1803_v10 }
 0x20f   :  { %1328 = vmatpush1.bf16.msra.mxu0 %v1801_v11 }
 0x210   :  { %1329 = vmatprep.subr.bf16.mxu0 %v1809_v12 }
 0x213   :  { %1330 = vmatpush1.bf16.msra.mxu0 %v1807_v13 }
 0x214   :  { %1331 = vmatprep.subr.bf16.mxu0 %v1815_v14 }
 0x217   :  { %1332 = vmatpush1.bf16.msra.mxu0 %v1813_v20 }
 0x218   :  { %1333 = vmatprep.subr.bf16.mxu0 %v1821_v23 }
 0x21b   :  { %1334 = vmatpush1.bf16.msra.mxu0 %v1819_v25 }
 0x21c   :  { %1335 = vmatprep.subr.bf16.mxu0 %v1827_v27 }
 0x21f   :  { %1336 = vmatpush1.bf16.msra.mxu0 %v1825_v30 }
 0x276   :  { %v759_v29 = vpop.xlane.xlu0 %758 }
 0x2c2   :  { %v1635_v33 = vpop.f32.mrf.mxu0 }
 0x2c4   :  { %v1636_v35 = vpop.f32.mrf.mxu0 }
 0x2c5   :  { %v1637_v37 = vadd.f32 %v1636_v35, %v1635_v33 }
 0x2c6   :  { %v1638_v38 = vpop.f32.mrf.mxu0 }
 0x2c7   :  { %v1060_v39 = vadd.f32 %v1637_v37, %v1510_v34 }
 0x2c8   :  { %v1639_v40 = vpop.f32.mrf.mxu0 }
 0x2c9   :  { %v1100_v43 = vadd.f32 %v1659_v17, %v1060_v39 }
 0x2cb   :  { %v1105_v36 = vmax.f32 %v1100_v43, 0.0 }
 0x2cd   :  { %v1106_v45 = vpack.c.bf16 %v1105_v36, %v1105_v36 }
 0x2cf   :  { %1354 = vmatmul.mubr.bf16.vlgmr.msra.gmra.mxu0 %v1106_v45  ;;  %1395 = vmatmul.mubr.bf16.vlgmr.msra.gmra.mxu1 %v1106_v45 }
 0x38f   :  { %v1355_v49 = vpop.f32.mrf.mxu0  ;;  %v1396_v50 = vpop.f32.mrf.mxu1 }
 0x390   :  { %v1356_v51 = vadd.f32 %v1355_v49, %v1144_v47  ;;  %v1397_v9 = vadd.f32 %v1396_v50, %v1152_v41 }
 0x391   :  { %v1357_v52 = vpop.f32.mrf.mxu0  ;;  %v1398_v53 = vpop.f32.mrf.mxu1 }
 0x392   :  { %v1403_v54 = vmul.f32 0.5263158, %v1356_v51  ;;  %v1358_v55 = vadd.f32 %v1357_v52, %v1148_v48  ;;  %v1399_v12 = vadd.f32 %v1398_v53, %v1156_v7 }
 0x393   :  { %v1359_v56 = vpop.f32.mrf.mxu0  ;;  %v1400_v57 = vpop.f32.mrf.mxu1 }
 0x394   :  { %1839 = vtanh.f32 %v1403_v54  ;;  %v1404_v58 = vmul.f32 0.5263158, %v1358_v55 }
 0x395   :  { %v1360_v59 = vpop.f32.mrf.mxu0  ;;  %v1401_v60 = vpop.f32.mrf.mxu1 }
 0x396   :  { %1841 = vtanh.f32 %v1404_v58 }
 0x3a1   :  { %v1840_v61 = vpop.eup %1839 }
 0x3a2   :  { %v1407_v62 = vmul.f32 1.9, %v1840_v61 }
 0x3a3   :  { %v1842_v3 = vpop.eup %1841 }
 0x3a4   :  { %v1408_v63 = vmul.f32 1.9, %v1842_v3  ;;  %v1409_v4 = vmul.f32 1.442695, %v1407_v62 }
 0x3a6   :  { %v1411_v5 = vmul.f32 1.442695, %v1408_v63  ;;  %v1417_v6 = vadd.f32 %v1408_v63, %v1407_v62  ;;  %1843 = vpow2.f32 %v1409_v4 }
 0x3a8   :  { %1845 = vpow2.f32 %v1411_v5  ;;  %1418 = vadd.xlane.f32.xlu0 %v1417_v6 }
 0x3b3   :  { %v1844_v8 = vpop.eup %1843 }
 0x3b4   :  { %v1413_v10 = vmul.f32 %v1844_v8, %v2016_v44 }
 0x3b5   :  { %v1846_v11 = vpop.eup %1845 }
 0x3b6   :  { %v1414_v13 = vmul.f32 %v1846_v11, %v2010_v42  ;;  %v1415_v15 = vadd.f32 %v1413_v10, %v1397_v9 }
 0x3b8   :  { %v1416_v16 = vadd.f32 %v1414_v13, %v1399_v12  ;;  %v1421_v17 = vmul.f32 %v1415_v15, %v1415_v15 }
 0x3ba   :  { %v1422_v14 = vmul.f32 %v1416_v16, %v1416_v16 }
 0x3bc   :  { %v1423_v18 = vadd.f32 %v1422_v14, %v1421_v17 }
 0x3be   :  { %1424 = vadd.xlane.f32.xlu1 %v1423_v18 }
 0x3c2   :  { %1429 = vadd.xlane.f32.xlu1 %v2154_v0 }
 0x431   :  { %v1419_v32 = vpop.xlane.xlu0 %1418 }
 0x432   :  { %v1420_v20 = vadd.f32 %v1419_v32, %v759_v29 }
 0x434   :  { %v1436_v22 = vsel %vm1435_vm0, %v1420_v20, 0.0 }
 0x447   :  { %v1425_v19 = vpop.xlane.xlu1 %1424 }
 0x44b   :  { %v1430_v44 = vpop.xlane.xlu1 %1429 }
 0x44c   :  { %v1431_v21 = vadd.f32 %v1430_v44, %v1425_v19 }
 0x44e   :  { %v1437_v42 = vsel %vm1434_vm1, %v1431_v21, %v1436_v22 }
 0x44f   :  { %1438 = vst [vmem:[%s2189_s11] sm:$0xff] %v1437_v42 }
 0x450   :  { %1443 = vsyncpa [#allocation3], 1 }
 0x451   :  { %1444 = vsyncpa [#allocation5], 1 }

</bundles_post_ra>
